<compile_context>
chip_gen: v7x
topology: tpu7x:2x2x1
jax: 0.10.0
libtpu: 0.0.40
codegen_flags: <defaults>
</compile_context>

<pallas_src>
import jax
import jax.numpy as jnp
from jax import lax
from jax.experimental import pallas as pl
from jax.experimental.pallas import tpu as pltpu


def _pick_c_tile(C, max_tile=256):
    """Largest divisor of C that is <= max_tile."""
    t = min(C, max_tile)
    while C % t:
        t -= 1
    return t


def _build_tap_masks(H, W):
    """(8, H*W) f32 {0,1} SAME-padding validity planes for the 8 non-center
    3x3 taps, in (dy, dx) row-major order skipping (0, 0)."""
    idx = jnp.arange(H * W, dtype=jnp.int32)
    h = idx // W
    w = idx % W
    row = {-1: h >= 1, 0: None, 1: h <= H - 2}
    col = {-1: w >= 1, 0: None, 1: w <= W - 2}
    planes = []
    for dy in (-1, 0, 1):
        for dx in (-1, 0, 1):
            if dy == 0 and dx == 0:
                continue
            m = jnp.ones((H * W,), dtype=bool)
            if row[dy] is not None:
                m = m & row[dy]
            if col[dx] is not None:
                m = m & col[dx]
            planes.append(m)
    return jnp.stack(planes, axis=0).astype(jnp.float32)


def _make_kernel(C, H, W):
    HW = H * W
    inv_c = 1.0 / float(C)

    def kernel(w_ref, mask_ref, x_ref, o_ref, sum_ref, max_ref):
        # w_ref:    SMEM (18,) f32 = conv1.weight (1, 2, 3, 3) flattened (OIHW).
        # mask_ref: VMEM (8, HW) f32 per-tap boundary masks (non-center taps).
        # x_ref:    VMEM (c_tile, HW) block (batch dim squeezed), native dtype.
        # o_ref:    VMEM (1, HW) block, written only on the last C step.
        # sum_ref/max_ref: VMEM (1, HW) f32 running channel-sum / channel-max.
        c = pl.program_id(1)
        last = pl.num_programs(1) - 1

        xb = x_ref[...]                                            # (c_tile, HW)
        psum = jnp.sum(xb, axis=0, keepdims=True, dtype=jnp.float32)
        pmax = jnp.max(xb, axis=0, keepdims=True).astype(jnp.float32)

        @pl.when(c == 0)
        def _():
            sum_ref[...] = psum
            max_ref[...] = pmax

        @pl.when(c != 0)
        def _():
            sum_ref[...] = sum_ref[...] + psum
            max_ref[...] = jnp.maximum(max_ref[...], pmax)

        @pl.when(c == last)
        def _():
            avg = sum_ref[...] * inv_c                             # (1, HW) f32
            mx = max_ref[...]                                      # (1, HW) f32

            # Hoisted loop-invariant SMEM scalar reads: [0:9] = avg-channel
            # weights, [9:18] = max-channel weights (PyTorch OIHW order).
            wv = [w_ref[i] for i in range(18)]

            acc = jnp.zeros((1, HW), jnp.float32)
            tap_i = 0
            for ky in range(3):
                dy = ky - 1
                for kx in range(3):
                    dx = kx - 1
                    k = ky * 3 + kx
                    # Pre-mix the two input channels of this tap: one plane
                    # per tap instead of two -> 8 rolls / 8 mask muls total.
                    mixed = wv[k] * avg + wv[9 + k] * mx
                    off = dy * W + dx            # flat-index offset of this tap
                    if off == 0:
                        tap = mixed
                    else:
                        # tap[i] = mixed[i + off] (circular; wrap masked below)
                        tap = pltpu.roll(mixed, shift=(-off) % HW, axis=1)
                    if dy != 0 or dx != 0:
                        tap = tap * mask_ref[pl.ds(tap_i, 1), :]
                        tap_i += 1
                    acc = acc + tap

            o_ref[...] = jax.nn.sigmoid(acc).astype(o_ref.dtype)   # full-lane store

    return kernel


def spatial_attention2(x, conv_w, *, max_c_tile=256):
    """x: (N, C, H, W) f32/bf16; conv_w: (1, 2, 3, 3) PyTorch OIHW.
    Returns (N, 1, H, W) in x.dtype."""
    N, C, H, W = x.shape
    HW = H * W
    c_tile = _pick_c_tile(C, max_c_tile)
    n_c = C // c_tile

    x_flat = x.reshape(N, C, HW)                          # lane-dense layout
    w_flat = conv_w.reshape(-1).astype(jnp.float32)       # (18,)
    masks = _build_tap_masks(H, W)                        # (8, HW) f32

    out_dtype = x.dtype
    in_item = jnp.dtype(x.dtype).itemsize
    out_item = jnp.dtype(out_dtype).itemsize
    vmem_bytes = (
        2 * c_tile * HW * in_item       # double-buffered x block
        + 2 * masks.size * 4            # double-buffered mask block
        + 2 * HW * out_item             # double-buffered out block
        + 2 * HW * 4                    # sum + max scratch
        + (4 << 20)                     # headroom for in-kernel temporaries
    )
    vmem_limit = int(min(max(vmem_bytes, 16 << 20), 64 << 20))

    out_flat = pl.pallas_call(
        _make_kernel(C, H, W),
        out_shape=jax.ShapeDtypeStruct((N, 1, HW), out_dtype),
        grid_spec=pltpu.PrefetchScalarGridSpec(
            num_scalar_prefetch=0,
            grid=(N, n_c),                                 # batch, then C reduction
            in_specs=[
                pl.BlockSpec(memory_space=pltpu.MemorySpace.SMEM),        # weights
                pl.BlockSpec((8, HW), lambda n, c: (0, 0)),               # tap masks
                pl.BlockSpec((None, c_tile, HW), lambda n, c: (n, c, 0)),  # x
            ],
            out_specs=pl.BlockSpec((None, 1, HW), lambda n, c: (n, 0, 0)),
            scratch_shapes=[
                pltpu.VMEM((1, HW), jnp.float32),          # running channel-sum
                pltpu.VMEM((1, HW), jnp.float32),          # running channel-max
            ],
        ),
        compiler_params=pltpu.CompilerParams(
            dimension_semantics=("parallel", "arbitrary"),
            vmem_limit_bytes=vmem_limit,
        ),
    )(w_flat, masks, x_flat)

    return out_flat.reshape(N, 1, H, W)


def spatial_attention2_ref(x, conv_w):
    """Pure-JAX reference (mirrors the PyTorch forward)."""
    xf = x.astype(jnp.float32)
    avg = jnp.mean(xf, axis=1, keepdims=True)
    mx = jnp.max(xf, axis=1, keepdims=True)
    cat = jnp.concatenate([avg, mx], axis=1)               # (N, 2, H, W)
    y = lax.conv_general_dilated(
        cat, conv_w.astype(jnp.float32), window_strides=(1, 1), padding="SAME",
        dimension_numbers=("NCHW", "OIHW", "NCHW"))
    return jax.nn.sigmoid(y)


if __name__ == "__main__":
    key = jax.random.PRNGKey(0)
    kx, kw = jax.random.split(key)

    N, C, H, W = 2, 4, 16, 16
    x = jax.random.normal(kx, (N, C, H, W), dtype=jnp.float32)

    # Deterministic "conv1" weight init: shape (out=1, in=2, 3, 3), no bias.
    fan_in = 2 * 3 * 3
    conv_w = jax.random.uniform(
        kw, (1, 2, 3, 3), dtype=jnp.float32,
        minval=-(fan_in ** -0.5), maxval=(fan_in ** -0.5))

    out = spatial_attention2(x, conv_w)
    out = jax.block_until_ready(out)

    ref = spatial_attention2_ref(x, conv_w)
    assert out.shape == (N, 1, H, W)
    assert jnp.allclose(out.astype(jnp.float32), ref, atol=1e-5, rtol=1e-5), \
        "mismatch vs reference"

    print("KERNEL_OK")
</pallas_src>

<mosaic_0001>
module attributes {stable_mosaic.version = 11 : i64} {
  func.func @kernel(%arg0: i32, %arg1: i32, %arg2: memref<18xf32, #tpu.memory_space<smem>>, %arg3: memref<8x256xf32, #tpu.memory_space<vmem>>, %arg4: memref<1x4x256xf32, #tpu.memory_space<vmem>>, %arg5: memref<1x1x256xf32, #tpu.memory_space<vmem>>, %arg6: memref<1x256xf32, #tpu.memory_space<vmem>>, %arg7: memref<1x256xf32, #tpu.memory_space<vmem>>) attributes {dimension_semantics = [#tpu.dimension_semantics<parallel>, #tpu.dimension_semantics<arbitrary>], iteration_bounds = array<i64: 2, 1>, scalar_prefetch = 0 : i64, scratch_operands = 2 : i64, tpu.core_type = #tpu.core_type<tc>, window_params = [{transform_indices = @transform_0, window_bounds = array<i64: 18>}, {pipeline_mode = #tpu.pipeline_mode<synchronous>, transform_indices = @transform_1, window_bounds = array<i64: 8, 256>}, {transform_indices = @transform_2, window_bounds = array<i64: 1, 4, 256>}, {transform_indices = @transform_3, window_bounds = array<i64: 1, 1, 256>}]} {
    %c0 = arith.constant 0 : index
    %c0_0 = arith.constant 0 : index
    %c0_1 = arith.constant 0 : index
    %0 = vector.load %arg4[%c0, %c0_0, %c0_1] : memref<1x4x256xf32, #tpu.memory_space<vmem>>, vector<1x4x256xf32>
    %1 = vector.shape_cast %0 : vector<1x4x256xf32> to vector<4x256xf32>
    %cst = arith.constant dense<0.000000e+00> : vector<256xf32>
    %2 = vector.multi_reduction <add>, %1, %cst [0] : vector<4x256xf32> to vector<256xf32>
    %3 = vector.shape_cast %2 : vector<256xf32> to vector<1x256xf32>
    %cst_2 = arith.constant dense<0xFF800000> : vector<256xf32>
    %4 = vector.multi_reduction <maximumf>, %1, %cst_2 [0] : vector<4x256xf32> to vector<256xf32>
    %5 = vector.shape_cast %4 : vector<256xf32> to vector<1x256xf32>
    %c0_i32 = arith.constant 0 : i32
    %6 = arith.cmpi eq, %arg1, %c0_i32 : i32
    %7 = arith.extui %6 : i1 to i32
    %c0_i32_3 = arith.constant 0 : i32
    %8 = arith.cmpi ne, %7, %c0_i32_3 : i32
    scf.if %8 {
      %c0_8 = arith.constant 0 : index
      %c0_9 = arith.constant 0 : index
      %15 = vector.load %arg6[%c0_8, %c0_9] : memref<1x256xf32, #tpu.memory_space<vmem>>, vector<1x256xf32>
      tpu.vector_store %arg6[%c0_8, %c0_9], %3 {strides = array<i32>} : memref<1x256xf32, #tpu.memory_space<vmem>>, vector<1x256xf32>,
      %c0_10 = arith.constant 0 : index
      %c0_11 = arith.constant 0 : index
      %16 = vector.load %arg7[%c0_10, %c0_11] : memref<1x256xf32, #tpu.memory_space<vmem>>, vector<1x256xf32>
      tpu.vector_store %arg7[%c0_10, %c0_11], %5 {strides = array<i32>} : memref<1x256xf32, #tpu.memory_space<vmem>>, vector<1x256xf32>,
    } else {
    }
    %c0_i32_4 = arith.constant 0 : i32
    %9 = arith.cmpi ne, %arg1, %c0_i32_4 : i32
    %10 = arith.extui %9 : i1 to i32
    %c0_i32_5 = arith.constant 0 : i32
    %11 = arith.cmpi ne, %10, %c0_i32_5 : i32
    scf.if %11 {
      %c0_8 = arith.constant 0 : index
      %c0_9 = arith.constant 0 : index
      %15 = vector.load %arg6[%c0_8, %c0_9] : memref<1x256xf32, #tpu.memory_space<vmem>>, vector<1x256xf32>
      %16 = arith.addf %15, %3 : vector<1x256xf32>
      %c0_10 = arith.constant 0 : index
      %c0_11 = arith.constant 0 : index
      %17 = vector.load %arg6[%c0_10, %c0_11] : memref<1x256xf32, #tpu.memory_space<vmem>>, vector<1x256xf32>
      tpu.vector_store %arg6[%c0_10, %c0_11], %16 {strides = array<i32>} : memref<1x256xf32, #tpu.memory_space<vmem>>, vector<1x256xf32>,
      %c0_12 = arith.constant 0 : index
      %c0_13 = arith.constant 0 : index
      %18 = vector.load %arg7[%c0_12, %c0_13] : memref<1x256xf32, #tpu.memory_space<vmem>>, vector<1x256xf32>
      %19 = arith.maximumf %18, %5 : vector<1x256xf32>
      %c0_14 = arith.constant 0 : index
      %c0_15 = arith.constant 0 : index
      %20 = vector.load %arg7[%c0_14, %c0_15] : memref<1x256xf32, #tpu.memory_space<vmem>>, vector<1x256xf32>
      tpu.vector_store %arg7[%c0_14, %c0_15], %19 {strides = array<i32>} : memref<1x256xf32, #tpu.memory_space<vmem>>, vector<1x256xf32>,
    } else {
    }
    %c0_i32_6 = arith.constant 0 : i32
    %12 = arith.cmpi eq, %arg1, %c0_i32_6 : i32
    %13 = arith.extui %12 : i1 to i32
    %c0_i32_7 = arith.constant 0 : i32
    %14 = arith.cmpi ne, %13, %c0_i32_7 : i32
    scf.if %14 {
      %c0_8 = arith.constant 0 : index
      %c0_9 = arith.constant 0 : index
      %15 = vector.load %arg6[%c0_8, %c0_9] : memref<1x256xf32, #tpu.memory_space<vmem>>, vector<1x256xf32>
      %cst_10 = arith.constant 2.500000e-01 : f32
      %16 = vector.broadcast %cst_10 : f32 to vector<1x256xf32>
      %17 = arith.mulf %15, %16 : vector<1x256xf32>
      %c0_11 = arith.constant 0 : index
      %c0_12 = arith.constant 0 : index
      %18 = vector.load %arg7[%c0_11, %c0_12] : memref<1x256xf32, #tpu.memory_space<vmem>>, vector<1x256xf32>
      %c0_13 = arith.constant 0 : index
      %19 = memref.load %arg2[%c0_13] : memref<18xf32, #tpu.memory_space<smem>>
      %c1 = arith.constant 1 : index
      %20 = memref.load %arg2[%c1] : memref<18xf32, #tpu.memory_space<smem>>
      %c2 = arith.constant 2 : index
      %21 = memref.load %arg2[%c2] : memref<18xf32, #tpu.memory_space<smem>>
      %c3 = arith.constant 3 : index
      %22 = memref.load %arg2[%c3] : memref<18xf32, #tpu.memory_space<smem>>
      %c4 = arith.constant 4 : index
      %23 = memref.load %arg2[%c4] : memref<18xf32, #tpu.memory_space<smem>>
      %c5 = arith.constant 5 : index
      %24 = memref.load %arg2[%c5] : memref<18xf32, #tpu.memory_space<smem>>
      %c6 = arith.constant 6 : index
      %25 = memref.load %arg2[%c6] : memref<18xf32, #tpu.memory_space<smem>>
      %c7 = arith.constant 7 : index
      %26 = memref.load %arg2[%c7] : memref<18xf32, #tpu.memory_space<smem>>
      %c8 = arith.constant 8 : index
      %27 = memref.load %arg2[%c8] : memref<18xf32, #tpu.memory_space<smem>>
      %c9 = arith.constant 9 : index
      %28 = memref.load %arg2[%c9] : memref<18xf32, #tpu.memory_space<smem>>
      %c10 = arith.constant 10 : index
      %29 = memref.load %arg2[%c10] : memref<18xf32, #tpu.memory_space<smem>>
      %c11 = arith.constant 11 : index
      %30 = memref.load %arg2[%c11] : memref<18xf32, #tpu.memory_space<smem>>
      %c12 = arith.constant 12 : index
      %31 = memref.load %arg2[%c12] : memref<18xf32, #tpu.memory_space<smem>>
      %c13 = arith.constant 13 : index
      %32 = memref.load %arg2[%c13] : memref<18xf32, #tpu.memory_space<smem>>
      %c14 = arith.constant 14 : index
      %33 = memref.load %arg2[%c14] : memref<18xf32, #tpu.memory_space<smem>>
      %c15 = arith.constant 15 : index
      %34 = memref.load %arg2[%c15] : memref<18xf32, #tpu.memory_space<smem>>
      %c16 = arith.constant 16 : index
      %35 = memref.load %arg2[%c16] : memref<18xf32, #tpu.memory_space<smem>>
      %c17 = arith.constant 17 : index
      %36 = memref.load %arg2[%c17] : memref<18xf32, #tpu.memory_space<smem>>
      %cst_14 = arith.constant 0.000000e+00 : f32
      %37 = vector.broadcast %cst_14 : f32 to vector<1x256xf32>
      %38 = vector.broadcast %19 : f32 to vector<1x256xf32>
      %39 = arith.mulf %38, %17 : vector<1x256xf32>
      %40 = vector.broadcast %28 : f32 to vector<1x256xf32>
      %41 = arith.mulf %40, %18 : vector<1x256xf32>
      %42 = arith.addf %39, %41 : vector<1x256xf32>
      %c17_i32 = arith.constant 17 : i32
      %43 = tpu.dynamic_rotate %42 by %c17_i32 dim 1 : vector<1x256xf32>, i32 -> vector<1x256xf32>
      %c0_15 = arith.constant 0 : index
      %c0_16 = arith.constant 0 : index
      %44 = vector.load %arg3[%c0_15, %c0_16] : memref<8x256xf32, #tpu.memory_space<vmem>>, vector<1x256xf32>
      %45 = arith.mulf %43, %44 : vector<1x256xf32>
      %46 = arith.addf %37, %45 : vector<1x256xf32>
      %47 = vector.broadcast %20 : f32 to vector<1x256xf32>
      %48 = arith.mulf %47, %17 : vector<1x256xf32>
      %49 = vector.broadcast %29 : f32 to vector<1x256xf32>
      %50 = arith.mulf %49, %18 : vector<1x256xf32>
      %51 = arith.addf %48, %50 : vector<1x256xf32>
      %c16_i32 = arith.constant 16 : i32
      %52 = tpu.dynamic_rotate %51 by %c16_i32 dim 1 : vector<1x256xf32>, i32 -> vector<1x256xf32>
      %c1_17 = arith.constant 1 : index
      %c0_18 = arith.constant 0 : index
      %53 = vector.load %arg3[%c1_17, %c0_18] : memref<8x256xf32, #tpu.memory_space<vmem>>, vector<1x256xf32>
      %54 = arith.mulf %52, %53 : vector<1x256xf32>
      %55 = arith.addf %46, %54 : vector<1x256xf32>
      %56 = vector.broadcast %21 : f32 to vector<1x256xf32>
      %57 = arith.mulf %56, %17 : vector<1x256xf32>
      %58 = vector.broadcast %30 : f32 to vector<1x256xf32>
      %59 = arith.mulf %58, %18 : vector<1x256xf32>
      %60 = arith.addf %57, %59 : vector<1x256xf32>
      %c15_i32 = arith.constant 15 : i32
      %61 = tpu.dynamic_rotate %60 by %c15_i32 dim 1 : vector<1x256xf32>, i32 -> vector<1x256xf32>
      %c2_19 = arith.constant 2 : index
      %c0_20 = arith.constant 0 : index
      %62 = vector.load %arg3[%c2_19, %c0_20] : memref<8x256xf32, #tpu.memory_space<vmem>>, vector<1x256xf32>
      %63 = arith.mulf %61, %62 : vector<1x256xf32>
      %64 = arith.addf %55, %63 : vector<1x256xf32>
      %65 = vector.broadcast %22 : f32 to vector<1x256xf32>
      %66 = arith.mulf %65, %17 : vector<1x256xf32>
      %67 = vector.broadcast %31 : f32 to vector<1x256xf32>
      %68 = arith.mulf %67, %18 : vector<1x256xf32>
      %69 = arith.addf %66, %68 : vector<1x256xf32>
      %c1_i32 = arith.constant 1 : i32
      %70 = tpu.dynamic_rotate %69 by %c1_i32 dim 1 : vector<1x256xf32>, i32 -> vector<1x256xf32>
      %c3_21 = arith.constant 3 : index
      %c0_22 = arith.constant 0 : index
      %71 = vector.load %arg3[%c3_21, %c0_22] : memref<8x256xf32, #tpu.memory_space<vmem>>, vector<1x256xf32>
      %72 = arith.mulf %70, %71 : vector<1x256xf32>
      %73 = arith.addf %64, %72 : vector<1x256xf32>
      %74 = vector.broadcast %23 : f32 to vector<1x256xf32>
      %75 = arith.mulf %74, %17 : vector<1x256xf32>
      %76 = vector.broadcast %32 : f32 to vector<1x256xf32>
      %77 = arith.mulf %76, %18 : vector<1x256xf32>
      %78 = arith.addf %75, %77 : vector<1x256xf32>
      %79 = arith.addf %73, %78 : vector<1x256xf32>
      %80 = vector.broadcast %24 : f32 to vector<1x256xf32>
      %81 = arith.mulf %80, %17 : vector<1x256xf32>
      %82 = vector.broadcast %33 : f32 to vector<1x256xf32>
      %83 = arith.mulf %82, %18 : vector<1x256xf32>
      %84 = arith.addf %81, %83 : vector<1x256xf32>
      %c255_i32 = arith.constant 255 : i32
      %85 = tpu.dynamic_rotate %84 by %c255_i32 dim 1 : vector<1x256xf32>, i32 -> vector<1x256xf32>
      %c4_23 = arith.constant 4 : index
      %c0_24 = arith.constant 0 : index
      %86 = vector.load %arg3[%c4_23, %c0_24] : memref<8x256xf32, #tpu.memory_space<vmem>>, vector<1x256xf32>
      %87 = arith.mulf %85, %86 : vector<1x256xf32>
      %88 = arith.addf %79, %87 : vector<1x256xf32>
      %89 = vector.broadcast %25 : f32 to vector<1x256xf32>
      %90 = arith.mulf %89, %17 : vector<1x256xf32>
      %91 = vector.broadcast %34 : f32 to vector<1x256xf32>
      %92 = arith.mulf %91, %18 : vector<1x256xf32>
      %93 = arith.addf %90, %92 : vector<1x256xf32>
      %c241_i32 = arith.constant 241 : i32
      %94 = tpu.dynamic_rotate %93 by %c241_i32 dim 1 : vector<1x256xf32>, i32 -> vector<1x256xf32>
      %c5_25 = arith.constant 5 : index
      %c0_26 = arith.constant 0 : index
      %95 = vector.load %arg3[%c5_25, %c0_26] : memref<8x256xf32, #tpu.memory_space<vmem>>, vector<1x256xf32>
      %96 = arith.mulf %94, %95 : vector<1x256xf32>
      %97 = arith.addf %88, %96 : vector<1x256xf32>
      %98 = vector.broadcast %26 : f32 to vector<1x256xf32>
      %99 = arith.mulf %98, %17 : vector<1x256xf32>
      %100 = vector.broadcast %35 : f32 to vector<1x256xf32>
      %101 = arith.mulf %100, %18 : vector<1x256xf32>
      %102 = arith.addf %99, %101 : vector<1x256xf32>
      %c240_i32 = arith.constant 240 : i32
      %103 = tpu.dynamic_rotate %102 by %c240_i32 dim 1 : vector<1x256xf32>, i32 -> vector<1x256xf32>
      %c6_27 = arith.constant 6 : index
      %c0_28 = arith.constant 0 : index
      %104 = vector.load %arg3[%c6_27, %c0_28] : memref<8x256xf32, #tpu.memory_space<vmem>>, vector<1x256xf32>
      %105 = arith.mulf %103, %104 : vector<1x256xf32>
      %106 = arith.addf %97, %105 : vector<1x256xf32>
      %107 = vector.broadcast %27 : f32 to vector<1x256xf32>
      %108 = arith.mulf %107, %17 : vector<1x256xf32>
      %109 = vector.broadcast %36 : f32 to vector<1x256xf32>
      %110 = arith.mulf %109, %18 : vector<1x256xf32>
      %111 = arith.addf %108, %110 : vector<1x256xf32>
      %c239_i32 = arith.constant 239 : i32
      %112 = tpu.dynamic_rotate %111 by %c239_i32 dim 1 : vector<1x256xf32>, i32 -> vector<1x256xf32>
      %c7_29 = arith.constant 7 : index
      %c0_30 = arith.constant 0 : index
      %113 = vector.load %arg3[%c7_29, %c0_30] : memref<8x256xf32, #tpu.memory_space<vmem>>, vector<1x256xf32>
      %114 = arith.mulf %112, %113 : vector<1x256xf32>
      %115 = arith.addf %106, %114 : vector<1x256xf32>
      %116 = arith.negf %115 : vector<1x256xf32>
      %117 = math.exp %116 : vector<1x256xf32>
      %cst_31 = arith.constant 1.000000e+00 : f32
      %118 = vector.broadcast %cst_31 : f32 to vector<1x256xf32>
      %119 = arith.addf %118, %117 : vector<1x256xf32>
      %120 = arith.divf %118, %119 : vector<1x256xf32>
      %c0_32 = arith.constant 0 : index
      %c0_33 = arith.constant 0 : index
      %c0_34 = arith.constant 0 : index
      %121 = vector.load %arg5[%c0_32, %c0_33, %c0_34] : memref<1x1x256xf32, #tpu.memory_space<vmem>>, vector<1x1x256xf32>
      %122 = vector.shape_cast %121 : vector<1x1x256xf32> to vector<1x256xf32>
      %123 = vector.shape_cast %120 : vector<1x256xf32> to vector<1x1x256xf32>
      tpu.vector_store %arg5[%c0_32, %c0_33, %c0_34], %123 {strides = array<i32>} : memref<1x1x256xf32, #tpu.memory_space<vmem>>, vector<1x1x256xf32>,
    } else {
    }
    return
  }
  func.func @transform_0(%arg0: i32, %arg1: i32) -> i32 {
    %c0_i32 = arith.constant 0 : i32
    %c0_i32_0 = arith.constant 0 : i32
    return %c0_i32 : i32
  }
  func.func @transform_1(%arg0: i32, %arg1: i32) -> (i32, i32) {
    %c0_i32 = arith.constant 0 : i32
    %c0_i32_0 = arith.constant 0 : i32
    %c0_i32_1 = arith.constant 0 : i32
    return %c0_i32, %c0_i32_0 : i32, i32
  }
  func.func @transform_2(%arg0: i32, %arg1: i32) -> (i32, i32, i32) {
    %c0_i32 = arith.constant 0 : i32
    %c0_i32_0 = arith.constant 0 : i32
    return %arg0, %arg1, %c0_i32 : i32, i32, i32
  }
  func.func @transform_3(%arg0: i32, %arg1: i32) -> (i32, i32, i32) {
    %c0_i32 = arith.constant 0 : i32
    %c0_i32_0 = arith.constant 0 : i32
    %c0_i32_1 = arith.constant 0 : i32
    return %arg0, %c0_i32, %c0_i32_0 : i32, i32, i32
  }
}

</mosaic_0001>

<bundles_post_ra>
// kernel: tpu_custom_call.1
= control target key start
LH: loop header
LB: loop body
LE: loop exit
PB: predicated region body
PF: predicated region fallthrough
CT: control target
= control target key end

     0   :  { %8 = vsyncpa [#allocation7], 0  ;;  %s1597_s0 = inlined_call_operand.hbm [shape: f32[18], index: 0, kind: input, shape index: {}]   ;;  %s1598_s1 = inlined_call_operand.hbm [shape: f32[8,256], index: 1, kind: input, shape index: {}]   ;;  %s1599_s2 = inlined_call_operand.hbm [shape: f32[2,4,256], index: 2, kind: input, shape index: {}]   ;;  %s1600_s3 = inlined_call_operand.hbm [shape: f32[2,1,256], index: 3, kind: output, shape index: {}]  }
   0x1   :  { %9 = vsyncpa [#allocation5], 0 }
   0x2   :  { %10 = vsyncpa [#allocation10], 0 }
   0x3   :  { %12 = vsyncpa [#allocation10 + $0x1], 0 }
   0x4   :  { %13 = vsyncpa [#allocation6], 0 }
   0x5   :  { %15 = vsyncpa [#allocation6 + $0x1], 0  ;;  %s1212_s12 = smov 0   ;;  %s1214_s13 = smov 0  }
   0x6   :  { %s1216_s14 = smov 0   ;;  %s1218_s15 = smov 0  }
   0x7   :  { %s1220_s16 = smov 0   ;;  %s1222_s17 = smov 0  }
   0x8 LB: > { %s875_s18 = sadd.s32 4294967295, %s1177_s17   ;;  %s876_s19 = sadd.s32 4294967294, %s1177_s17   ;;  %s1177_s17 = sphi %s1222_s17, %s21_s17   ;;  %s1173_s16 = sphi %s1220_s16, %s1625_s16   ;;  %s1169_s15 = sphi %s1218_s15, %s1624_s15   ;;  %s1165_s14 = sphi %s1216_s14, %s1623_s14   ;;  %s1161_s13 = sphi %s1214_s13, %s1622_s13   ;;  %s1157_s12 = sphi %s1212_s12, %s1621_s12  }
   0x9   : > { %p97_p0 = scmp.ne.s32.totalorder %s1161_s13, %s1157_s12  ;;  %p1246_p1 = scmp.eq.s32.totalorder %s875_s18, 0 }
   0xa   : > { %p1250_p2 = scmp.eq.s32.totalorder %s875_s18, 1  ;;  %p127_p3 = scmp.eq.s32.totalorder %s876_s19, 1 }
   0xb   : > { %s1605_s20 = scalar_select %p1246_p1, 1, 0 }
   0xc   : > { %p1256_p4 = por %p1246_p1, %p97_p0  ;;  %p877_p5 = scmp.ge.s32.totalorder %s1177_s17, 1 }
   0xd   : > { %p1261_p6 = por %p127_p3, %p97_p0  ;;  %p134_p7 = scmp.lt.s32.totalorder %s1177_s17, 3 }
   0xe   : > { %s1607_s22 = scalar_select %p1256_p4, 1, 0 }
   0xf   : > { %s1608_s23 = scalar_select %p1261_p6, 1, 0 }
  0x10   : > { %p1266_p8 = pnand %p877_p5, %p134_p7  ;;  %s1179_s25 = smov [#allocation8]  }
  0x11   : > { %s156_s26 = sshll.u32 %s1179_s25, 4  ;;  %s33_s28 = sadd.s32 1, %s1173_s16  ;;  %s1273_s26 = int_to_ptr.vmem [resolvable:$true] %s156_s26 }
  0x12   : > { %s1609_s24 = scalar_select %p1266_p8, 1, 0 }
  0x13   : > { %p927_p10 = pneg %p1266_p8  ;;  %p1284_p12 = scmp.ge.s32.totalorder %s33_s28, 2 }
  0x14   : > { %s1016_s5 = scalar_lea.hbm %s1597_s0, 16 }
  0x15   : > { %p1277_p11 = pnand %p927_p10, %p1246_p1  ;;  %p1017_p13 = scmp.ne.s32.totalorder %s1597_s0, %s1016_s5 }
  0x16   : > { %p1023_p7 = scmp.lt.u32.totalorder %s1016_s5, %s1597_s0 }
  0x17   : > { %p1018_p0 = pneg %p1277_p11 }
  0x19   : > { %p1019_p3 = pnand %p1018_p0, %p1017_p13 }
  0x1b   : > { %p1020_p5 = pneg %p1019_p3 }
  0x1d   : > { %p1025_p10 = pnand %p1023_p7, %p1020_p5 }
  0x1f   : > { %1028 = shalt.err (!%p1025_p10)
}
  0x20   : > { %s1180_s10 = smov [#allocation4]   ;;  %s1029_s30 = scalar_lea.hbm %s1598_s1, 256 }
  0x21   : > { %930 = dma.hbm_to_smem (!%p1277_p11), %s1597_s0, 16, %s1180_s10, [#allocation7]  }
  0x22   : > { %p1030_p13 = scmp.ne.s32.totalorder %s1598_s1, %s1029_s30  ;;  %p1036_p7 = scmp.lt.u32.totalorder %s1029_s30, %s1598_s1 }
  0x24   : > { %p1032_p3 = pnand %p1030_p13, %p1018_p0 }
  0x26   : > { %p1033_p5 = pneg %p1032_p3 }
  0x28   : > { %p1038_p10 = pnand %p1036_p7, %p1033_p5 }
  0x2a   : > { %1041 = shalt.err (!%p1038_p10)
}
  0x2b   : > { %s1042_s8 = scalar_lea.vmem %s1273_s26, 256  ;;  %p1050_p1 = scmp.lt.s32.totalorder %s1273_s26, %s1273_s26 }
  0x2c   : > { %p1043_p9 = scmp.ne.s32.totalorder %s1273_s26, %s1042_s8  ;;  %p1051_p13 = scmp.lt.s32.totalorder %s1042_s8, %s1042_s8 }
  0x2e   : > { %p1045_p6 = pnand %p1043_p9, %p1018_p0  ;;  %p1052_p3 = por %p1051_p13, %p1050_p1 }
  0x30   : > { %p1046_p4 = pneg %p1045_p6 }
  0x32   : > { %p1053_p8 = pnand %p1052_p3, %p1046_p4 }
  0x34   : > { %1056 = shalt.err (!%p1053_p8)
}
  0x35   : > { %933 = dma.hbm_to_vmem [thread:$0]  (!%p1277_p11), %s1598_s1, 256, %s1273_s26, [#allocation5]  }
  0x36   : > { %s1627_s28 = smov (%p1284_p12, %s33_s28), 0  ;;  %s84_s27 = sadd.s32 1, %s1165_s14 }
  0x37   : > { %p91_p1 = scmp.ne.s32.totalorder %s1165_s14, %s1161_s13  ;;  %s79_s11 = ssub.s32 %s1173_s16, %s1627_s28 }
  0x38   : > { %p92_p4 = scmp.eq.s32.totalorder %s1177_s17, 0  ;;  %p82_p6 = scmp.eq.s32.totalorder %s79_s11, 0 }
  0x39   : > { %p1346_p8 = por %p1250_p2, %p91_p1  ;;  %p944_p0 = scmp.lt.s32.totalorder %s1177_s17, 2 }
  0x3a   : > { %p93_p9 = por %p92_p4, %p91_p1  ;;  %s167_s26 = sand.u32 1, %s1165_s14  }
  0x3b   : > { %s1352_s19 = scalar_select %p82_p6, %s1165_s14, %s84_s27  }
  0x3c   : > { %s913_s25 = sshll.u32 %s1173_s16, 7  ;;  %s881_s29 = sshll.u32 %s167_s26, 3 }
  0x3d   : > { %s1359_s6 = scalar_lea.hbm %s1599_s2, %s913_s25  ;;  %s171_s21 = scalar_lea.vmem [#allocation9], %s881_s29 }
  0x3e   : > { %s181_s5 = sshll.u32 %s171_s21, 4  ;;  %p1361_p2 = pnand %p944_p0, %p93_p9  ;;  %s1365_s5 = int_to_ptr.vmem [resolvable:$true] %s181_s5 }
  0x3f   : > { %s168_s8 = scalar_lea.sflag [#allocation10], %s167_s26  ;;  %s1057_s9 = scalar_lea.hbm %s1359_s6, 128 }
  0x40   : > { %p1058_p11 = scmp.ne.s32.totalorder %s1359_s6, %s1057_s9  ;;  %p1059_p12 = pneg %p1361_p2 }
  0x41   : > { %s1062_s11 = scalar_lea.hbm %s1599_s2, 256  ;;  %p1063_p10 = scmp.lt.u32.totalorder %s1359_s6, %s1599_s2 }
  0x42   : > { %p1060_p5 = pnand %p1059_p12, %p1058_p11  ;;  %p1064_p13 = scmp.lt.u32.totalorder %s1062_s11, %s1057_s9 }
  0x43   : > { %p1066_p1 = scmp.lt.u32.totalorder %s1057_s9, %s1359_s6 }
  0x44   : > { %p1061_p7 = pneg %p1060_p5  ;;  %p1065_p3 = por %p1064_p13, %p1063_p10 }
  0x46   : > { %p1067_p4 = por %p1066_p1, %p1065_p3 }
  0x48   : > { %p1068_p6 = pnand %p1067_p4, %p1061_p7 }
  0x4a   : > { %1071 = shalt.err (!%p1068_p6)
}
  0x4b   : > { %s1072_s26 = scalar_lea.vmem %s1365_s5, 128  ;;  %s1181_s30 = smov [#allocation9]  }
  0x4c   : > { %p1073_p9 = scmp.ne.s32.totalorder %s1365_s5, %s1072_s26  ;;  %s1077_s4 = sshll.u32 %s1181_s30, 4  ;;  %s1078_s4 = int_to_ptr.vmem [resolvable:$false] %s1077_s4 }
  0x4d   : > { %s1079_s21 = scalar_lea.vmem %s1078_s4, 256  ;;  %p1080_p5 = scmp.lt.s32.totalorder %s1365_s5, %s1078_s4 }
  0x4e   : > { %p1075_p0 = pnand %p1073_p9, %p1059_p12  ;;  %p1081_p10 = scmp.lt.s32.totalorder %s1079_s21, %s1072_s26 }
  0x50   : > { %p1076_p11 = pneg %p1075_p0  ;;  %p1082_p13 = por %p1081_p10, %p1080_p5 }
  0x52   : > { %p1083_p3 = pnand %p1082_p13, %p1076_p11 }
  0x54   : > { %1086 = shalt.err (!%p1083_p3)
}
  0x55   : > { %937 = dma.hbm_to_vmem [thread:$0]  (!%p1361_p2), %s1359_s6, 128, %s1365_s5, %s168_s8  }
  0x56   : > { %p1614_p7 = scmp.ne.s32.totalorder %s1609_s24, 0 }
  0x57   : > { %p1615_p12 = scmp.ne.s32.totalorder (!%p1614_p7), %s1605_s20, 0 }
  0x58   : > { %190 = sbr.rel (%p1614_p7) target bundleno = 337 (0x151), region = 32 }
  0x5f   : > { %1140 = dma.done.wait (%p1615_p12), [#allocation7], 16  }
  0x60   : > { %1142 = vsyncadd (%p1615_p12), [#allocation7], 4294967280 }
  0x61   : > { %1144 = dma.done.wait (%p1615_p12), [#allocation5], 256  }
  0x62   : > { %1146 = vsyncadd (%p1615_p12), [#allocation5], 4294967040  ;;  %s1403_s7 = sand.u32 1, %s1161_s13   ;;  %p1616_p2 = scmp.ne.s32.totalorder %s1607_s22, 0 }
  0x63   : > { %s887_s24 = sshll.u32 %s1403_s7, 3  ;;  %s201_s6 = scalar_lea.sflag [#allocation10], %s1403_s7 }
  0x64   : > { %s204_s5 = scalar_lea.vmem [#allocation9], %s887_s24 }
  0x65   : > { %1148 = dma.done.wait (%p1616_p2), %s201_s6, 128  }
  0x66   : > { %1150 = vsyncadd (%p1616_p2), %s201_s6, 4294967168 }
  0x67   : > { %209 = sfence }
  0x68   : > { %v228_v0 = vld [vmem:[%s204_s5] sm:$0xff]  ;;  %vm232_vm0 = vcmask 1043456   ;;  %v1182_v12 = vmov 1966171168   ;;  %v271_v14 = vlaneseq  ;;  %s898_s20 = sld [smem:[#allocation4 + $0xa]]  ;;  %s897_s22 = sld [smem:[#allocation4 + $0x9]] }
  0x69   : > { %v230_v1 = vcombine.high %v228_v0, %v228_v0  ;;  %v233_v2 = vsel %vm232_vm0, %v228_v0, 0.0  ;;  %v247_v3 = vsel %vm232_vm0, %v228_v0, -inf  ;;  %v269_v13 = vunpack.c.l.s4 %v1182_v12  ;;  %s889_s8 = sld [smem:[#allocation4 + $0x1]]  ;;  %s363_s9 = sld [smem:[#allocation4]] }
  0x6a   : > { %v234_v4 = vrot.slane %v233_v2, 4  ;;  %v248_v5 = vrot.slane %v247_v3, 4  ;;  %v272_v24 = vshrl.u32 %v271_v14, 7  ;;  %vm1417_vm1 = vcmp.lt.s32.totalorder %v271_v14, 256  ;;  %s890_s10 = sld [smem:[#allocation4 + $0x2]]  ;;  %s899_s27 = sld [smem:[#allocation4 + $0xb]] }
  0x6b   : > { %v240_v6 = vsel %vm232_vm0, %v230_v1, 0.0  ;;  %v254_v7 = vsel %vm232_vm0, %v230_v1, -inf  ;;  %v270_v23 = vunpack.c.0.s8 %v269_v13  ;;  %s1427_s11 = sld [smem:[#allocation4 + $0x3]]  ;;  %s1429_s25 = sld [smem:[#allocation4 + $0xc]] }
  0x6c   : > { %v235_v8 = vadd.f32 %v234_v4, %v233_v2  ;;  %v241_v9 = vrot.slane %v240_v6, 4  ;;  %v249_v10 = vmax.f32 %v247_v3, %v248_v5  ;;  %v255_v11 = vrot.slane %v254_v7, 4  ;;  %s1433_s29 = sld [smem:[#allocation4 + $0x5]]  ;;  %s1439_s26 = sld [smem:[#allocation4 + $0xe]] }
  0x6d   : > { %v1412_v35 = vsub.s32 %v270_v23, %v272_v24  ;;  %v1441_v54 = vsub.s32 0, %v272_v24  ;;  %s1445_s30 = sld [smem:[#allocation4 + $0x6]]  ;;  %s1447_s4 = sld [smem:[#allocation4 + $0xf]]  ;;  %v1449_v57 = vsub.s32 1, %v272_v24 }
  0x6e   : > { %v236_v15 = vrot.slane %v235_v8, 2  ;;  %v242_v16 = vadd.f32 %v241_v9, %v240_v6  ;;  %v250_v17 = vrot.slane %v249_v10, 2  ;;  %v256_v18 = vmax.f32 %v254_v7, %v255_v11  ;;  %s1453_s21 = sld [smem:[#allocation4 + $0x4]]  ;;  %s901_s24 = sld [smem:[#allocation4 + $0xd]] }
  0x6f   : > { %v424_v43 = vstv %s898_s20  ;;  %v383_v44 = vstv %s897_s22  ;;  %v422_v47 = vstv %s889_s8  ;;  %v381_v48 = vstv %s363_s9  ;;  %s1462_s6 = sld [smem:[#allocation4 + $0x7]]  ;;  %s1183_s5 = smov 16  }
  0x70   : > { %v237_v19 = vadd.f32 %v236_v15, %v235_v8  ;;  %v243_v20 = vrot.slane %v242_v16, 2  ;;  %v251_v21 = vmax.f32 %v249_v10, %v250_v17  ;;  %v257_v22 = vrot.slane %v256_v18, 2  ;;  %s1184_s20 = smov 17   ;;  %s904_s22 = sld [smem:[#allocation4 + $0x10]] }
  0x71   : > { %v462_v52 = vstv %s890_s10  ;;  %v464_v53 = vstv %s899_s27  ;;  %v502_v58 = vstv %s1427_s11  ;;  %v504_v59 = vstv %s1429_s25  ;;  %s896_s8 = sld [smem:[#allocation4 + $0x8]]  ;;  %s1475_s9 = sld [smem:[#allocation4 + $0x11]] }
  0x72   : > { %v238_v25 = vrot.slane %v237_v19, 1  ;;  %v244_v26 = vadd.f32 %v243_v20, %v242_v16  ;;  %v252_v27 = vrot.slane %v251_v21, 1  ;;  %v258_v28 = vmax.f32 %v256_v18, %v257_v22  ;;  %s1185_s10 = smov 15   ;;  %s1186_s27 = smov 1  }
  0x73   : > { %v560_v4 = vstv %s1433_s29  ;;  %v562_v8 = vstv %s1439_s26  ;;  %v600_v9 = vstv %s1445_s30  ;;  %v602_v10 = vstv %s1447_s4  ;;  %s1187_s11 = smov 127   ;;  %s1188_s25 = smov 113  }
  0x74   : > { %v239_v29 = vadd.f32 %v238_v25, %v237_v19  ;;  %v245_v30 = vrot.slane %v244_v26, 1  ;;  %v253_v31 = vmax.f32 %v251_v21, %v252_v27  ;;  %v259_v32 = vrot.slane %v258_v28, 1  ;;  %s1189_s29 = smov 112   ;;  %s1190_s26 = smov 111  }
  0x75   : > { %v542_v15 = vstv %s1453_s21  ;;  %v544_v19 = vstv %s901_s24  ;;  %v640_v23 = vstv %s1462_s6  ;;  %s888_s30 = sshll.u32 %s1403_s7, 1  ;;  %s914_s4 = sshll.u32 %s1169_s15, 5 }
  0x76   : > { %v246_v33 = vadd.f32 %v245_v30, %v244_v26  ;;  %v260_v34 = vmax.f32 %v258_v28, %v259_v32  ;;  %v642_v28 = vstv %s904_s22  ;;  %s227_s21 = scalar_lea.vmem [#allocation11], %s888_s30  ;;  %s756_s15 = scalar_lea.sflag [#allocation6], %s1403_s7 }
  0x77   : > { %s770_s24 = sshll.u32 %s227_s21, 4  ;;  %s1548_s24 = int_to_ptr.vmem [resolvable:$true] %s770_s24 }
  0x78   : > { %v267_v36 = vcombine.low %v239_v29, %v246_v33  ;;  %v290_v37 = vcombine.low %v253_v31, %v260_v34  ;;  %s1087_s22 = scalar_lea.vmem %s1548_s24, 32 }
  0x79   : > { %p1088_p1 = scmp.ne.s32.totalorder %s1548_s24, %s1087_s22 }
  0x7a   : > { %v274_v38 = vrot.slane %v267_v36, %v1412_v35  ;;  %v297_v39 = vrot.slane %v290_v37, %v1412_v35  ;;  %v680_v37 = vstv %s896_s8  ;;  %s1191_s8 = smov [#allocation11]  }
  0x7b   : > { %p1089_p4 = pnand %p1088_p1, %p1346_p8 }
  0x7c   : > { %v281_v41 = vrot.slane %v274_v38, %v1412_v35  ;;  %v304_v42 = vrot.slane %v297_v39, %v1412_v35  ;;  %v682_v38 = vstv %s1475_s9  ;;  %s1091_s9 = sshll.u32 %s1191_s8, 4  ;;  %s1092_s9 = int_to_ptr.vmem [resolvable:$false] %s1091_s9 }
  0x7d   : > { %p1090_p6 = pneg %p1089_p4  ;;  %p1094_p9 = scmp.lt.s32.totalorder %s1548_s24, %s1092_s9 }
  0x7e   : > { %287 = vst.msk [vmem:[#allocation2] sm:$0x3] %vm1417_vm1, %v281_v41  ;;  %306 = vst.msk [vmem:[#allocation3] sm:$0x3] %vm1417_vm1, %v304_v42 }
  0x85   : > { %v360_v45 = vld [vmem:[#allocation2] sm:$0x3]  ;;  %v1431_v46 = vld [vmem:[#allocation3] sm:$0x3] }
  0x86   : > { %v1435_v49 = vmul.f32 0.25, %v360_v45  ;;  %v425_v50 = vmul.f32 %v424_v43, %v1431_v46  ;;  %v384_v51 = vmul.f32 %v383_v44, %v1431_v46  ;;  %v465_v63 = vmul.f32 %v464_v53, %v1431_v46 }
  0x87   : > { %v505_v3 = vmul.f32 %v504_v59, %v1431_v46  ;;  %v563_v13 = vmul.f32 %v562_v8, %v1431_v46  ;;  %v545_v20 = vmul.f32 %v544_v19, %v1431_v46  ;;  %v603_v22 = vmul.f32 %v602_v10, %v1431_v46  ;;  %v486_v59 = vld [vmem:[#allocation8 + $0x2] ss:$8 sm:$0x3] }
  0x88   : > { %v423_v55 = vmul.f32 %v422_v47, %v1435_v49  ;;  %v382_v56 = vmul.f32 %v381_v48, %v1435_v49  ;;  %v463_v62 = vmul.f32 %v462_v52, %v1435_v49  ;;  %v503_v2 = vmul.f32 %v502_v58, %v1435_v49  ;;  %v406_v52 = vld [vmem:[#allocation8] ss:$8 sm:$0x3] }
  0x89   : > { %v561_v12 = vmul.f32 %v560_v4, %v1435_v49  ;;  %v543_v18 = vmul.f32 %v542_v15, %v1435_v49  ;;  %v601_v21 = vmul.f32 %v600_v9, %v1435_v49  ;;  %v641_v31 = vmul.f32 %v640_v23, %v1435_v49  ;;  %v526_v9 = vld [vmem:[#allocation8 + $0x3] ss:$8 sm:$0x3] }
  0x8a   : > { %v426_v60 = vadd.f32 %v425_v50, %v423_v55  ;;  %v385_v61 = vadd.f32 %v384_v51, %v382_v56  ;;  %v466_v7 = vadd.f32 %v465_v63, %v463_v62  ;;  %v506_v11 = vadd.f32 %v505_v3, %v503_v2  ;;  %v446_v51 = vld [vmem:[#allocation8 + $0x1] ss:$8 sm:$0x3] }
  0x8b   : > { %v1481_v24 = vadd.f32 %v545_v20, %v543_v18  ;;  %v564_v27 = vadd.f32 %v563_v13, %v561_v12  ;;  %v643_v32 = vmul.f32 %v642_v28, %v1431_v46  ;;  %v604_v36 = vadd.f32 %v603_v22, %v601_v21  ;;  %v584_v21 = vld [vmem:[#allocation8 + $0x4] ss:$8 sm:$0x3] }
  0x8c   : > { %v431_v0 = vrot.slane %v426_v60, %v1441_v54  ;;  %v390_v1 = vrot.slane %v385_v61, %v1441_v54  ;;  %v435_v5 = vrot.slane %v426_v60, %v1449_v57  ;;  %v394_v6 = vrot.slane %v385_v61, %v1449_v57 }
  0x8d   : > { %v475_v16 = vrot.slane %v466_v7, %v1449_v57  ;;  %v471_v17 = vrot.slane %v466_v7, %v1441_v54  ;;  %v515_v25 = vrot.slane %v506_v11, %v1449_v57  ;;  %v511_v26 = vrot.slane %v506_v11, %v1441_v54 }
  0x8e   : > { %438 = vrot.lane.b32.xlu1 %v431_v0, %s1183_s5  ;;  %397 = vrot.lane.b32.xlu0 %v390_v1, %s1184_s20  ;;  %v551_v29 = vrot.slane %v1481_v24, %v1441_v54  ;;  %v555_v30 = vrot.slane %v1481_v24, %v1449_v57  ;;  %v573_v33 = vrot.slane %v564_v27, %v1449_v57 }
  0x8f   : > { %v569_v34 = vrot.slane %v564_v27, %v1441_v54  ;;  %v644_v39 = vadd.f32 %v643_v32, %v641_v31  ;;  %v681_v41 = vmul.f32 %v680_v37, %v1435_v49  ;;  %v613_v42 = vrot.slane %v604_v36, %v1449_v57 }
  0x90   : > { %v609_v43 = vrot.slane %v604_v36, %v1441_v54  ;;  %v683_v44 = vmul.f32 %v682_v38, %v1431_v46  ;;  %v1503_v46 = vand.u32 127, %v271_v14  ;;  %v451_v56 = vrot.slane %v446_v51, %v1441_v54  ;;  %v624_v36 = vld [vmem:[#allocation8 + $0x5] ss:$8 sm:$0x3] }
  0x91   : > { %v653_v45 = vrot.slane %v644_v39, %v1449_v57  ;;  %v649_v47 = vrot.slane %v644_v39, %v1441_v54  ;;  %v455_v58 = vrot.slane %v446_v51, %v1449_v57  ;;  %v411_v60 = vrot.slane %v406_v52, %v1441_v54  ;;  %v664_v51 = vld [vmem:[#allocation8 + $0x6] ss:$8 sm:$0x3] }
  0x92   : > { %440 = vrot.lane.b32.xlu1 %v435_v5, %s1183_s5  ;;  %399 = vrot.lane.b32.xlu0 %v394_v6, %s1184_s20  ;;  %v684_v48 = vadd.f32 %v683_v44, %v681_v41  ;;  %vm442_vm2 = vcmp.lt.s32.totalorder %v1503_v46, 16  ;;  %vm403_vm3 = vcmp.lt.s32.totalorder %v1503_v46, 17  ;;  %v415_v61 = vrot.slane %v406_v52, %v1449_v57  ;;  %s1546_s20 = scalar_lea.hbm %s1600_s3, %s914_s4 }
  0x93   : > { %vm482_vm4 = vcmp.lt.s32.totalorder %v1503_v46, 15  ;;  %v491_v63 = vrot.slane %v486_v59, %v1441_v54  ;;  %v495_v0 = vrot.slane %v486_v59, %v1449_v57  ;;  %vm522_vm5 = vcmp.lt.s32.totalorder %v1503_v46, 1 }
  0x94   : > { %v693_v49 = vrot.slane %v684_v48, %v1449_v57  ;;  %v689_v50 = vrot.slane %v684_v48, %v1441_v54  ;;  %v531_v19 = vrot.slane %v526_v9, %v1441_v54  ;;  %v535_v20 = vrot.slane %v526_v9, %v1449_v57 }
  0x95   : > { %vm580_vm6 = vcmp.lt.s32.totalorder %v1503_v46, 127  ;;  %vm620_vm7 = vcmp.lt.s32.totalorder %v1503_v46, 113  ;;  %v629_v44 = vrot.slane %v624_v36, %v1441_v54  ;;  %vm660_vm8 = vcmp.lt.s32.totalorder %v1503_v46, 112 }
  0x96   : > { %480 = vrot.lane.b32.xlu1 %v475_v16, %s1185_s10  ;;  %478 = vrot.lane.b32.xlu0 %v471_v17, %s1185_s10  ;;  %vm700_vm9 = vcmp.lt.s32.totalorder %v1503_v46, 111  ;;  %s1093_s10 = scalar_lea.vmem %s1092_s9, 64 }
  0x97   : > { %p1095_p0 = scmp.lt.s32.totalorder %s1093_s10, %s1087_s22 }
  0x99   : > { %p1096_p11 = por %p1095_p0, %p1094_p9 }
  0x9a   : > { %520 = vrot.lane.b32.xlu1 %v515_v25, %s1186_s27  ;;  %518 = vrot.lane.b32.xlu0 %v511_v26, %s1186_s27 }
  0x9b   : > { %p1097_p5 = pnand %p1096_p11, %p1090_p6 }
  0x9e   : > { %578 = vrot.lane.b32.xlu1 %v573_v33, %s1187_s11  ;;  %576 = vrot.lane.b32.xlu0 %v569_v34, %s1187_s11  ;;  %v589_v33 = vrot.slane %v584_v21, %v1441_v54  ;;  %v593_v34 = vrot.slane %v584_v21, %v1449_v57 }
  0xa2   : > { %618 = vrot.lane.b32.xlu1 %v613_v42, %s1188_s25  ;;  %616 = vrot.lane.b32.xlu0 %v609_v43, %s1188_s25 }
  0xa6   : > { %658 = vrot.lane.b32.xlu1 %v653_v45, %s1189_s29  ;;  %656 = vrot.lane.b32.xlu0 %v649_v47, %s1189_s29  ;;  %v633_v45 = vrot.slane %v624_v36, %v1449_v57 }
  0xaa   : > { %698 = vrot.lane.b32.xlu1 %v693_v49, %s1190_s26  ;;  %696 = vrot.lane.b32.xlu0 %v689_v50, %s1190_s26 }
 0x100   : > { %v439_v53 = vpop.permute.xlu1 %438  ;;  %v398_v55 = vpop.permute.xlu0 %397 }
 0x104   : > { %v441_v62 = vpop.permute.xlu1 %440  ;;  %v400_v14 = vpop.permute.xlu0 %399 }
 0x105   : > { %v443_v1 = vsel %vm442_vm2, %v439_v53, %v441_v62  ;;  %v444_v2 = vsel %vm442_vm2, %v441_v62, %v439_v53  ;;  %v404_v3 = vsel %vm403_vm3, %v398_v55, %v400_v14  ;;  %v405_v4 = vsel %vm403_vm3, %v400_v14, %v398_v55  ;;  %v704_v14 = vld [vmem:[#allocation8 + $0x7] ss:$8 sm:$0x3] }
 0x106   : > { %v458_v5 = vmul.f32 %v451_v56, %v444_v2  ;;  %v459_v6 = vmul.f32 %v455_v58, %v443_v1  ;;  %v418_v7 = vmul.f32 %v411_v60, %v405_v4  ;;  %v419_v8 = vmul.f32 %v415_v61, %v404_v3 }
 0x107   : > { %v669_v62 = vrot.slane %v664_v51, %v1441_v54 }
 0x108   : > { %v460_v10 = vadd.f32 %v458_v5, %v418_v7  ;;  %v461_v11 = vadd.f32 %v459_v6, %v419_v8  ;;  %v481_v12 = vpop.permute.xlu1 %480  ;;  %v479_v13 = vpop.permute.xlu0 %478  ;;  %v709_v5 = vrot.slane %v704_v14, %v1441_v54  ;;  %v713_v6 = vrot.slane %v704_v14, %v1449_v57 }
 0x109   : > { %v483_v15 = vsel %vm482_vm4, %v479_v13, %v481_v12  ;;  %v484_v16 = vsel %vm482_vm4, %v481_v12, %v479_v13 }
 0x10a   : > { %v498_v17 = vmul.f32 %v491_v63, %v484_v16  ;;  %v499_v18 = vmul.f32 %v495_v0, %v483_v15 }
 0x10c   : > { %v500_v22 = vadd.f32 %v498_v17, %v460_v10  ;;  %v501_v23 = vadd.f32 %v499_v18, %v461_v11  ;;  %v521_v25 = vpop.permute.xlu1 %520  ;;  %v519_v26 = vpop.permute.xlu0 %518 }
 0x10d   : > { %v523_v27 = vsel %vm522_vm5, %v519_v26, %v521_v25  ;;  %v524_v28 = vsel %vm522_vm5, %v521_v25, %v519_v26 }
 0x10e   : > { %v538_v31 = vmul.f32 %v531_v19, %v524_v28  ;;  %v539_v32 = vmul.f32 %v535_v20, %v523_v27 }
 0x110   : > { %v540_v37 = vadd.f32 %v538_v31, %v500_v22  ;;  %v541_v38 = vadd.f32 %v539_v32, %v501_v23  ;;  %v579_v39 = vpop.permute.xlu1 %578  ;;  %v577_v41 = vpop.permute.xlu0 %576 }
 0x111   : > { %v581_v42 = vsel %vm580_vm6, %v577_v41, %v579_v39  ;;  %v582_v43 = vsel %vm580_vm6, %v579_v39, %v577_v41 }
 0x112   : > { %v558_v47 = vadd.f32 %v551_v29, %v540_v37  ;;  %v559_v48 = vadd.f32 %v555_v30, %v541_v38  ;;  %v596_v49 = vmul.f32 %v589_v33, %v581_v42  ;;  %v597_v50 = vmul.f32 %v593_v34, %v582_v43 }
 0x113   : > { %v673_v29 = vrot.slane %v664_v51, %v1449_v57 }
 0x114   : > { %v598_v52 = vadd.f32 %v596_v49, %v558_v47  ;;  %v599_v53 = vadd.f32 %v597_v50, %v559_v48  ;;  %v619_v55 = vpop.permute.xlu1 %618  ;;  %v617_v56 = vpop.permute.xlu0 %616 }
 0x115   : > { %v621_v58 = vsel %vm620_vm7, %v617_v56, %v619_v55  ;;  %v622_v59 = vsel %vm620_vm7, %v619_v55, %v617_v56 }
 0x116   : > { %v636_v60 = vmul.f32 %v629_v44, %v621_v58  ;;  %v637_v61 = vmul.f32 %v633_v45, %v622_v59 }
 0x118   : > { %v638_v24 = vadd.f32 %v636_v60, %v598_v52  ;;  %v639_v30 = vadd.f32 %v637_v61, %v599_v53  ;;  %v659_v63 = vpop.permute.xlu1 %658  ;;  %v657_v0 = vpop.permute.xlu0 %656 }
 0x119   : > { %v661_v1 = vsel %vm660_vm8, %v657_v0, %v659_v63  ;;  %v662_v2 = vsel %vm660_vm8, %v659_v63, %v657_v0 }
 0x11a   : > { %v676_v3 = vmul.f32 %v669_v62, %v661_v1  ;;  %v677_v4 = vmul.f32 %v673_v29, %v662_v2 }
 0x11c   : > { %v678_v7 = vadd.f32 %v676_v3, %v638_v24  ;;  %v679_v8 = vadd.f32 %v677_v4, %v639_v30  ;;  %v699_v9 = vpop.permute.xlu1 %698  ;;  %v697_v10 = vpop.permute.xlu0 %696 }
 0x11d   : > { %v701_v11 = vsel %vm700_vm9, %v697_v10, %v699_v9  ;;  %v702_v12 = vsel %vm700_vm9, %v699_v9, %v697_v10 }
 0x11e   : > { %v716_v13 = vmul.f32 %v709_v5, %v701_v11  ;;  %v717_v15 = vmul.f32 %v713_v6, %v702_v12 }
 0x120   : > { %v718_v16 = vadd.f32 %v716_v13, %v678_v7  ;;  %v719_v17 = vadd.f32 %v717_v15, %v679_v8 }
 0x122   : > { %v906_v18 = vmul.f32 -1.442695, %v718_v16  ;;  %v907_v46 = vmul.f32 -1.442695, %v719_v17 }
 0x124   : > { %1008 = vpow2.f32 %v906_v18 }
 0x125   : > { %1010 = vpow2.f32 %v907_v46 }
 0x12e   : > { %v1009_v19 = vpop.eup %1008 }
 0x12f   : > { %v1011_v54 = vpop.eup %1010  ;;  %v726_v20 = vadd.f32 1.0, %v1009_v19 }
 0x130   : > { %v727_v57 = vadd.f32 1.0, %v1011_v54 }
 0x131   : > { %1012 = vrcp.f32 %v726_v20 }
 0x132   : > { %1014 = vrcp.f32 %v727_v57 }
 0x13b   : > { %v1013_v21 = vpop.eup %1012 }
 0x13c   : > { %v1015_v22 = vpop.eup %1014 }
 0x13d   : > { %v734_v23 = vcombine.low %v1013_v21, %v1015_v22 }
 0x13f   : > { %v741_v25 = vrot.slane %v734_v23, %v1412_v35 }
 0x141   : > { %v748_v26 = vrot.slane %v741_v25, %v1412_v35 }
 0x143   : > { %754 = vst.msk [vmem:[%s227_s21] sm:$0x3] %vm1417_vm1, %v748_v26 }
 0x144   : > { %1100 = shalt.err (!%p1097_p5)
}
 0x145   : > { %s1101_s7 = scalar_lea.hbm %s1546_s20, 32  ;;  %s1105_s25 = scalar_lea.hbm %s1600_s3, 64 }
 0x146   : > { %p1102_p10 = scmp.ne.s32.totalorder %s1546_s20, %s1101_s7  ;;  %p1106_p7 = scmp.lt.u32.totalorder %s1546_s20, %s1600_s3 }
 0x147   : > { %p1107_p12 = scmp.lt.u32.totalorder %s1105_s25, %s1101_s7  ;;  %p1109_p1 = scmp.lt.u32.totalorder %s1101_s7, %s1546_s20 }
 0x148   : > { %p1103_p13 = pnand %p1102_p10, %p1346_p8 }
 0x149   : > { %p1108_p2 = por %p1107_p12, %p1106_p7 }
 0x14a   : > { %p1104_p3 = pneg %p1103_p13 }
 0x14b   : > { %p1110_p4 = por %p1109_p1, %p1108_p2 }
 0x14d   : > { %p1111_p6 = pnand %p1110_p4, %p1104_p3 }
 0x14f   : > { %1114 = shalt.err (!%p1111_p6)
}
 0x150   : > { %925 = dma.vmem_to_hbm [thread:$0]  (%p1346_p8), %s1548_s24, 32, %s1546_s20, %s756_s15  }
 0x151 PF: > { %s782_s30 = sand.u32 1, %s1157_s12   ;;  %p1619_p9 = scmp.ne.s32.totalorder %s1608_s23, 0 }
 0x152   : > { %p1620_p0 = scmp.ge.s32.totalorder %s1177_s17, 2  ;;  %s783_s4 = scalar_lea.sflag [#allocation6], %s782_s30 }
 0x154   : > { %p939_p11 = pnand %p1620_p0, %p1619_p9 }
 0x156   : > { %1152 = dma.done.wait (!%p939_p11), %s783_s4, 32  }
 0x157   : > { %1154 = vsyncadd (!%p939_p11), %s783_s4, 4294967264  ;;  %s21_s17 = sadd.s32 1, %s1177_s17   ;;  %s1621_s12 = smov %s1161_s13 }
 0x158   : > { %p18_p5 = scmp.ge.s32.totalorder %s21_s17, 4   ;;  %s1622_s13 = smov %s1165_s14 }
 0x159   : > { %s1623_s14 = smov %s1352_s19  ;;  %s1624_s15 = smov %s1173_s16 }
 0x15a   : > { %s1625_s16 = smov %s1627_s28  ;;  %20 = sbr.rel (!%p18_p5) target bundleno = 8 (0x8), region = 106 }
 0x161   :  { %788 = vsyncpa [#allocation5], 1 }
 0x162   :  { %790 = vsyncpa [#allocation5 + $0x1], 1 }
 0x163   :  { %791 = vsyncpa [#allocation10], 1 }
 0x164   :  { %793 = vsyncpa [#allocation10 + $0x1], 1 }
 0x165   :  { %794 = vsyncpa [#allocation6], 1 }
 0x166   :  { %796 = vsyncpa [#allocation6 + $0x1], 1 }
 0x167   :  { %797 = vsyncpa [#allocation7], 1 }
 0x168   :  { %799 = vsyncpa [#allocation7 + $0x1], 1 }

</bundles_post_ra>
